<compile_context>
chip_gen: v7x
topology: tpu7x:2x2x1
jax: 0.10.0
libtpu: 0.0.40
codegen_flags: <defaults>
</compile_context>

<pallas_src>
import math
import jax
import jax.numpy as jnp
from jax.experimental import pallas as pl
from jax.experimental.pallas import tpu as pltpu

# Pendulum-v1 dimensions / bounds (hard-coded; no gym dependency).
STATE_DIM = 3
HIDDEN_DIM = 128
ACTION_DIM = 1
ACTION_BOUND = 2.0

A = ACTION_DIM
_LOG_SQRT_2PI = 0.5 * math.log(2.0 * math.pi)


def policy_kernel(xT_ref, w1T_ref, b1T_ref, whT_ref, bhT_ref, epsT_ref, out_ref):
    xT = xT_ref[...]                     # [S, tb]   batch on the lane axis
    w1T = w1T_ref[...]                   # [H, S]

    # fc1 + ReLU as a 3-term VPU FMA chain (avoids a K=3 MXU matmul entirely).
    hT = (w1T[:, 0:1] * xT[0:1, :]
          + w1T[:, 1:2] * xT[1:2, :]
          + w1T[:, 2:3] * xT[2:3, :]
          + b1T_ref[...])                # [H, tb]
    hT = jnp.maximum(hT, 0.0)

    # Fused mu/std heads: one MXU matmul, output lane-dense along the batch.
    heads = jnp.dot(whT_ref[...], hT,
                    preferred_element_type=jnp.float32) + bhT_ref[...]   # [2A, tb]
    mu = heads[0:A, :]                                   # [A, tb]
    std = jnp.logaddexp(heads[A:2 * A, :], 0.0)          # softplus

    # Normal(mu, std).rsample() with externally supplied eps ~ N(0, 1).
    eps = epsT_ref[...]                                  # [A, tb]
    sample = mu + std * eps

    # Normal.log_prob(sample): (sample - mu)/std == eps, so skip the divide.
    log_prob = -0.5 * eps * eps - jnp.log(std) - _LOG_SQRT_2PI

    # tanh squash. NOTE: the reference applies tanh AGAIN inside the log-det
    # correction (log(1 - tanh(action)^2 + 1e-7)); reproduce that exactly.
    action = jnp.tanh(sample)
    log_prob = log_prob - jnp.log(1.0 - jnp.tanh(action) ** 2 + 1e-07)

    out_ref[0:A, :] = action * ACTION_BOUND
    out_ref[A:2 * A, :] = log_prob


def policy_net_forward(x, params, eps, *, tb=256):
    """Run PolicyNet forward. x: [B, STATE_DIM]; eps: [B, ACTION_DIM]."""
    B, S = x.shape
    assert S == STATE_DIM
    tb = min(tb, B)
    assert tb % 128 == 0 and B % tb == 0, "tb must be a multiple of 128 dividing B"
    w1, b1, w_mu, b_mu, w_std, b_std = params

    # Lane-dense repacking (pure layout plumbing, done outside the kernel).
    xT = x.T                                           # [S, B]
    epsT = eps.T                                       # [A, B]
    w1T = w1.T                                         # [H, S]
    b1T = b1.T                                         # [H, 1]
    whT = jnp.concatenate([w_mu, w_std], axis=1).T     # [2A, H]  (fused heads)
    bhT = jnp.concatenate([b_mu, b_std], axis=1).T     # [2A, 1]

    grid = (B // tb,)
    full = lambda shape: pl.BlockSpec(shape, lambda i: (0, 0))
    batch_spec = lambda rows: pl.BlockSpec((rows, tb), lambda i: (0, i))

    outT = pl.pallas_call(
        policy_kernel,
        out_shape=jax.ShapeDtypeStruct((2 * A, B), jnp.float32),
        grid_spec=pltpu.PrefetchScalarGridSpec(
            num_scalar_prefetch=0,
            grid=grid,
            in_specs=[
                batch_spec(STATE_DIM),               # xT
                full((HIDDEN_DIM, STATE_DIM)),       # w1T
                full((HIDDEN_DIM, 1)),               # b1T
                full((2 * A, HIDDEN_DIM)),           # whT (fused mu/std weights)
                full((2 * A, 1)),                    # bhT (fused mu/std biases)
                batch_spec(A),                       # epsT
            ],
            out_specs=batch_spec(2 * A),             # packed [action; log_prob]
        ),
        compiler_params=pltpu.CompilerParams(
            dimension_semantics=("parallel",)),
    )(xT, w1T, b1T, whT, bhT, epsT)

    action = outT[0:A, :].T              # [B, A], already scaled by ACTION_BOUND
    log_prob = outT[A:2 * A, :].T        # [B, A]
    return action, log_prob


def init_params(key):
    """Deterministic parameter init (uniform fan-in, like torch.nn.Linear default)."""
    ks = jax.random.split(key, 6)

    def linear(kw, kb, fan_in, fan_out):
        bound = 1.0 / math.sqrt(fan_in)
        w = jax.random.uniform(kw, (fan_in, fan_out), jnp.float32, -bound, bound)
        b = jax.random.uniform(kb, (1, fan_out), jnp.float32, -bound, bound)
        return w, b

    w1, b1 = linear(ks[0], ks[1], STATE_DIM, HIDDEN_DIM)
    w_mu, b_mu = linear(ks[2], ks[3], HIDDEN_DIM, ACTION_DIM)
    w_std, b_std = linear(ks[4], ks[5], HIDDEN_DIM, ACTION_DIM)
    return (w1, b1, w_mu, b_mu, w_std, b_std)


if __name__ == "__main__":
    key = jax.random.PRNGKey(0)
    k_params, k_x, k_eps = jax.random.split(key, 3)

    B = 512  # batch of states (2 grid steps at tb=256 -> both v7x TCs get work)
    params = init_params(k_params)
    # Pendulum observations are (cos theta, sin theta, theta_dot) — use N(0,1) test data.
    x = jax.random.normal(k_x, (B, STATE_DIM), jnp.float32)
    eps = jax.random.normal(k_eps, (B, ACTION_DIM), jnp.float32)  # rsample noise

    action, log_prob = policy_net_forward(x, params, eps, tb=256)
    jax.block_until_ready((action, log_prob))

    # Pure-JAX reference check of the exact forward semantics.
    w1, b1, w_mu, b_mu, w_std, b_std = params
    h = jax.nn.relu(x @ w1 + b1)
    mu = h @ w_mu + b_mu
    std = jax.nn.softplus(h @ w_std + b_std)
    sample = mu + std * eps
    lp = -0.5 * ((sample - mu) / std) ** 2 - jnp.log(std) - _LOG_SQRT_2PI
    act = jnp.tanh(sample)
    lp = lp - jnp.log(1.0 - jnp.tanh(act) ** 2 + 1e-07)
    act = act * ACTION_BOUND

    assert jnp.allclose(action, act, atol=1e-5, rtol=1e-5)
    assert jnp.allclose(log_prob, lp, atol=1e-5, rtol=1e-5)

    print("KERNEL_OK")
</pallas_src>

<mosaic_0001>
module attributes {stable_mosaic.version = 11 : i64} {
  func.func @policy_kernel(%arg0: i32, %arg1: memref<3x256xf32, #tpu.memory_space<vmem>>, %arg2: memref<128x3xf32, #tpu.memory_space<vmem>>, %arg3: memref<128x1xf32, #tpu.memory_space<vmem>>, %arg4: memref<2x128xf32, #tpu.memory_space<vmem>>, %arg5: memref<2x1xf32, #tpu.memory_space<vmem>>, %arg6: memref<1x256xf32, #tpu.memory_space<vmem>>, %arg7: memref<2x256xf32, #tpu.memory_space<vmem>>) attributes {dimension_semantics = [#tpu.dimension_semantics<parallel>], iteration_bounds = array<i64: 2>, scalar_prefetch = 0 : i64, scratch_operands = 0 : i64, tpu.core_type = #tpu.core_type<tc>, window_params = [{transform_indices = @transform_0, window_bounds = array<i64: 3, 256>}, {pipeline_mode = #tpu.pipeline_mode<synchronous>, transform_indices = @transform_1, window_bounds = array<i64: 128, 3>}, {pipeline_mode = #tpu.pipeline_mode<synchronous>, transform_indices = @transform_2, window_bounds = array<i64: 128, 1>}, {pipeline_mode = #tpu.pipeline_mode<synchronous>, transform_indices = @transform_3, window_bounds = array<i64: 2, 128>}, {pipeline_mode = #tpu.pipeline_mode<synchronous>, transform_indices = @transform_4, window_bounds = array<i64: 2, 1>}, {transform_indices = @transform_5, window_bounds = array<i64: 1, 256>}, {transform_indices = @transform_6, window_bounds = array<i64: 2, 256>}]} {
    %c0 = arith.constant 0 : index
    %c0_0 = arith.constant 0 : index
    %0 = vector.load %arg1[%c0, %c0_0] : memref<3x256xf32, #tpu.memory_space<vmem>>, vector<3x256xf32>
    %c0_1 = arith.constant 0 : index
    %c0_2 = arith.constant 0 : index
    %1 = vector.load %arg2[%c0_1, %c0_2] : memref<128x3xf32, #tpu.memory_space<vmem>>, vector<128x3xf32>
    %2 = vector.extract_strided_slice %1 {offsets = [0, 0], sizes = [128, 1], strides = [1, 1]} : vector<128x3xf32> to vector<128x1xf32>
    %3 = vector.extract_strided_slice %0 {offsets = [0, 0], sizes = [1, 256], strides = [1, 1]} : vector<3x256xf32> to vector<1x256xf32>
    %4 = vector.broadcast %2 : vector<128x1xf32> to vector<128x256xf32>
    %5 = vector.broadcast %3 : vector<1x256xf32> to vector<128x256xf32>
    %6 = arith.mulf %4, %5 : vector<128x256xf32>
    %7 = vector.extract_strided_slice %1 {offsets = [0, 1], sizes = [128, 1], strides = [1, 1]} : vector<128x3xf32> to vector<128x1xf32>
    %8 = vector.extract_strided_slice %0 {offsets = [1, 0], sizes = [1, 256], strides = [1, 1]} : vector<3x256xf32> to vector<1x256xf32>
    %9 = vector.broadcast %7 : vector<128x1xf32> to vector<128x256xf32>
    %10 = vector.broadcast %8 : vector<1x256xf32> to vector<128x256xf32>
    %11 = arith.mulf %9, %10 : vector<128x256xf32>
    %12 = arith.addf %6, %11 : vector<128x256xf32>
    %13 = vector.extract_strided_slice %1 {offsets = [0, 2], sizes = [128, 1], strides = [1, 1]} : vector<128x3xf32> to vector<128x1xf32>
    %14 = vector.extract_strided_slice %0 {offsets = [2, 0], sizes = [1, 256], strides = [1, 1]} : vector<3x256xf32> to vector<1x256xf32>
    %15 = vector.broadcast %13 : vector<128x1xf32> to vector<128x256xf32>
    %16 = vector.broadcast %14 : vector<1x256xf32> to vector<128x256xf32>
    %17 = arith.mulf %15, %16 : vector<128x256xf32>
    %18 = arith.addf %12, %17 : vector<128x256xf32>
    %c0_3 = arith.constant 0 : index
    %c0_4 = arith.constant 0 : index
    %19 = vector.load %arg3[%c0_3, %c0_4] : memref<128x1xf32, #tpu.memory_space<vmem>>, vector<128x1xf32>
    %20 = vector.broadcast %19 : vector<128x1xf32> to vector<128x256xf32>
    %21 = arith.addf %18, %20 : vector<128x256xf32>
    %cst = arith.constant 0.000000e+00 : f32
    %22 = vector.broadcast %cst : f32 to vector<128x256xf32>
    %23 = arith.maximumf %21, %22 : vector<128x256xf32>
    %c0_5 = arith.constant 0 : index
    %c0_6 = arith.constant 0 : index
    %24 = vector.load %arg4[%c0_5, %c0_6] : memref<2x128xf32, #tpu.memory_space<vmem>>, vector<2x128xf32>
    %cst_7 = arith.constant dense<0.000000e+00> : vector<2x256xf32>
    %25 = tpu.matmul %24, %23, %cst_7 {dimension_numbers = #tpu.dot_dimension_numbers<[1], [0], [0], [1], [0, 0, 1, 1], [], []>} : vector<2x128xf32>, vector<128x256xf32>, vector<2x256xf32> -> vector<2x256xf32>
    %c0_8 = arith.constant 0 : index
    %c0_9 = arith.constant 0 : index
    %26 = vector.load %arg5[%c0_8, %c0_9] : memref<2x1xf32, #tpu.memory_space<vmem>>, vector<2x1xf32>
    %27 = vector.broadcast %26 : vector<2x1xf32> to vector<2x256xf32>
    %28 = arith.addf %25, %27 : vector<2x256xf32>
    %29 = vector.extract_strided_slice %28 {offsets = [0, 0], sizes = [1, 256], strides = [1, 1]} : vector<2x256xf32> to vector<1x256xf32>
    %30 = vector.extract_strided_slice %28 {offsets = [1, 0], sizes = [1, 256], strides = [1, 1]} : vector<2x256xf32> to vector<1x256xf32>
    %cst_10 = arith.constant 0.000000e+00 : f32
    %31 = vector.broadcast %cst_10 : f32 to vector<1x256xf32>
    %32 = arith.maximumf %30, %31 : vector<1x256xf32>
    %33 = vector.broadcast %cst_10 : f32 to vector<1x256xf32>
    %34 = arith.subf %30, %33 : vector<1x256xf32>
    %35 = arith.cmpf one, %34, %34 : vector<1x256xf32>
    %36 = vector.broadcast %cst_10 : f32 to vector<1x256xf32>
    %37 = arith.addf %30, %36 : vector<1x256xf32>
    %38 = math.absf %34 : vector<1x256xf32>
    %cst_11 = arith.constant 0.000000e+00 : f32
    %39 = vector.broadcast %cst_11 : f32 to vector<1x256xf32>
    %40 = arith.subf %39, %38 : vector<1x256xf32>
    %41 = math.exp %40 : vector<1x256xf32>
    %42 = math.log1p %41 : vector<1x256xf32>
    %43 = arith.addf %32, %42 : vector<1x256xf32>
    %44 = arith.select %35, %37, %43 : vector<1x256xi1>, vector<1x256xf32>
    %c0_12 = arith.constant 0 : index
    %c0_13 = arith.constant 0 : index
    %45 = vector.load %arg6[%c0_12, %c0_13] : memref<1x256xf32, #tpu.memory_space<vmem>>, vector<1x256xf32>
    %46 = arith.mulf %44, %45 : vector<1x256xf32>
    %47 = arith.addf %29, %46 : vector<1x256xf32>
    %cst_14 = arith.constant -5.000000e-01 : f32
    %48 = vector.broadcast %cst_14 : f32 to vector<1x256xf32>
    %49 = arith.mulf %48, %45 : vector<1x256xf32>
    %50 = arith.mulf %49, %45 : vector<1x256xf32>
    %51 = math.log %44 : vector<1x256xf32>
    %52 = arith.subf %50, %51 : vector<1x256xf32>
    %cst_15 = arith.constant 0.918938517 : f32
    %53 = vector.broadcast %cst_15 : f32 to vector<1x256xf32>
    %54 = arith.subf %52, %53 : vector<1x256xf32>
    %55 = math.tanh %47 : vector<1x256xf32>
    %56 = math.tanh %55 : vector<1x256xf32>
    %57 = arith.mulf %56, %56 : vector<1x256xf32>
    %cst_16 = arith.constant 1.000000e+00 : f32
    %58 = vector.broadcast %cst_16 : f32 to vector<1x256xf32>
    %59 = arith.subf %58, %57 : vector<1x256xf32>
    %cst_17 = arith.constant 1.000000e-07 : f32
    %60 = vector.broadcast %cst_17 : f32 to vector<1x256xf32>
    %61 = arith.addf %59, %60 : vector<1x256xf32>
    %62 = math.log %61 : vector<1x256xf32>
    %63 = arith.subf %54, %62 : vector<1x256xf32>
    %cst_18 = arith.constant 2.000000e+00 : f32
    %64 = vector.broadcast %cst_18 : f32 to vector<1x256xf32>
    %65 = arith.mulf %55, %64 : vector<1x256xf32>
    %c0_19 = arith.constant 0 : index
    %c0_20 = arith.constant 0 : index
    %66 = vector.load %arg7[%c0_19, %c0_20] : memref<2x256xf32, #tpu.memory_space<vmem>>, vector<1x256xf32>
    tpu.vector_store %arg7[%c0_19, %c0_20], %65 {strides = array<i32>} : memref<2x256xf32, #tpu.memory_space<vmem>>, vector<1x256xf32>,
    %c1 = arith.constant 1 : index
    %c0_21 = arith.constant 0 : index
    %67 = vector.load %arg7[%c1, %c0_21] : memref<2x256xf32, #tpu.memory_space<vmem>>, vector<1x256xf32>
    tpu.vector_store %arg7[%c1, %c0_21], %63 {strides = array<i32>} : memref<2x256xf32, #tpu.memory_space<vmem>>, vector<1x256xf32>,
    return
  }
  func.func @transform_0(%arg0: i32) -> (i32, i32) {
    %c0_i32 = arith.constant 0 : i32
    %c0_i32_0 = arith.constant 0 : i32
    return %c0_i32, %arg0 : i32, i32
  }
  func.func @transform_1(%arg0: i32) -> (i32, i32) {
    %c0_i32 = arith.constant 0 : i32
    %c0_i32_0 = arith.constant 0 : i32
    %c0_i32_1 = arith.constant 0 : i32
    return %c0_i32, %c0_i32_0 : i32, i32
  }
  func.func @transform_2(%arg0: i32) -> (i32, i32) {
    %c0_i32 = arith.constant 0 : i32
    %c0_i32_0 = arith.constant 0 : i32
    %c0_i32_1 = arith.constant 0 : i32
    return %c0_i32, %c0_i32_0 : i32, i32
  }
  func.func @transform_3(%arg0: i32) -> (i32, i32) {
    %c0_i32 = arith.constant 0 : i32
    %c0_i32_0 = arith.constant 0 : i32
    %c0_i32_1 = arith.constant 0 : i32
    return %c0_i32, %c0_i32_0 : i32, i32
  }
  func.func @transform_4(%arg0: i32) -> (i32, i32) {
    %c0_i32 = arith.constant 0 : i32
    %c0_i32_0 = arith.constant 0 : i32
    %c0_i32_1 = arith.constant 0 : i32
    return %c0_i32, %c0_i32_0 : i32, i32
  }
  func.func @transform_5(%arg0: i32) -> (i32, i32) {
    %c0_i32 = arith.constant 0 : i32
    %c0_i32_0 = arith.constant 0 : i32
    return %c0_i32, %arg0 : i32, i32
  }
  func.func @transform_6(%arg0: i32) -> (i32, i32) {
    %c0_i32 = arith.constant 0 : i32
    %c0_i32_0 = arith.constant 0 : i32
    return %c0_i32, %arg0 : i32, i32
  }
}

</mosaic_0001>

<bundles_post_ra>
// kernel: tpu_custom_call.1
= control target key start
LH: loop header
LB: loop body
LE: loop exit
PB: predicated region body
PF: predicated region fallthrough
CT: control target
= control target key end

     0   :  { %11 = vsyncpa [#allocation3], 0  ;;  %s1911_s0 = inlined_call_operand.vmem [shape: f32[3,512], index: 0, kind: input, shape index: {}]   ;;  %s1912_s1 = inlined_call_operand.vmem [shape: f32[128,3], index: 1, kind: input, shape index: {}]   ;;  %s1913_s2 = inlined_call_operand.vmem [shape: f32[128,1], index: 2, kind: input, shape index: {}]   ;;  %s1914_s3 = inlined_call_operand.vmem [shape: f32[2,128], index: 3, kind: input, shape index: {}]   ;;  %s1915_s4 = inlined_call_operand.vmem [shape: f32[2,1], index: 4, kind: input, shape index: {}]   ;;  %s1916_s5 = inlined_call_operand.vmem [shape: f32[1,512], index: 5, kind: input, shape index: {}]   ;;  %s1917_s6 = inlined_call_operand.hbm [shape: f32[2,512], index: 6, kind: output, shape index: {}]  }
   0x1   :  { %13 = vsyncpa [#allocation3 + $0x1], 0  ;;  %s1426_s21 = smov 0   ;;  %s1428_s22 = smov 0  }
   0x2   :  { %s1430_s23 = smov 0   ;;  %s1432_s24 = smov 0  }
   0x3 LB: > { %s1447_s25 = sadd.s32 4294967295, %s1383_s24   ;;  %s1178_s26 = sadd.s32 4294967294, %s1383_s24   ;;  %s1383_s24 = sphi %s1432_s24, %s1925_s24   ;;  %s1379_s23 = sphi %s1430_s23, %s1924_s23   ;;  %s1375_s22 = sphi %s1428_s22, %s1923_s22   ;;  %s1371_s21 = sphi %s1426_s21, %s1922_s21  }
   0x4   : > { %s1451_s27 = sadd.s32 1, %s1383_s24   ;;  %s162_s28 = sadd.s32 1, %s1379_s23 }
   0x5   : > { %s159_s29 = ssub.s32 %s1383_s24, %s1451_s27  ;;  %p172_p0 = scmp.ne.s32.totalorder %s1379_s23, %s1375_s22 }
   0x6   : > { %p160_p1 = scmp.eq.s32.totalorder %s159_s29, 0  ;;  %p173_p2 = scmp.eq.s32.totalorder %s1447_s25, 1 }
   0x7   : > { %p178_p3 = scmp.ne.s32.totalorder %s1375_s22, %s1371_s21  ;;  %p179_p4 = scmp.eq.s32.totalorder %s1178_s26, 1 }
   0x8   : > { %s1462_s30 = scalar_select %p160_p1, %s1379_s23, %s162_s28  }
   0x9   : > { %p1464_p5 = por %p173_p2, %p172_p0  ;;  %p1468_p6 = por %p179_p4, %p178_p3 }
   0xa   : > { %p1181_p7 = scmp.ge.s32.totalorder %s1383_s24, 1  ;;  %p226_p8 = scmp.lt.s32.totalorder %s1383_s24, 3 }
   0xc   : > { %p227_p9 = pnand %p1181_p7, %p226_p8 }
   0xd   : > { %v273_v0 = vld [vmem:[%s1912_s1] sm:$0xff] (!%p227_p9)  ;;  %v1385_v1 = vmov (!%p227_p9), 2   ;;  %v1386_v2 = vmov (!%p227_p9), 1   ;;  %v275_v3 = vld [vmem:[%s1912_s1 + $0x10] sm:$0xff] (!%p227_p9)  ;;  %v274_v4 = vld [vmem:[%s1912_s1 + $0x8] sm:$0xff] (!%p227_p9)  ;;  %v1387_v7 = vmov (!%p227_p9), 0   ;;  %v370_v40 = vlaneseq (!%p227_p9) }
   0xe   : > { %230 = sbr.rel (%p227_p9) target bundleno = 652 (0x28c), region = 44  ;;  %1271 = vset.pattern.permute.xlu0 (!%p227_p9), %v1385_v1  ;;  %1270 = vset.pattern.permute.xlu1 (!%p227_p9), %v1386_v2  ;;  %v278_v5 = vld [vmem:[%s1912_s1 + $0x28] sm:$0xff] (!%p227_p9)  ;;  %v277_v6 = vld [vmem:[%s1912_s1 + $0x20] sm:$0xff] (!%p227_p9)  ;;  %v280_v8 = vld [vmem:[%s1912_s1 + $0x38] sm:$0xff] (!%p227_p9)  ;;  %s1183_s20 = sshll.u32 (!%p227_p9), %s1447_s25, 1 }
   0xf   : > { %567 = vperm.xlu0 (!%p227_p9), %1271, %v273_v0   ;;  %421 = vperm.xlu1 (!%p227_p9), %1270, %v273_v0   ;;  %v1501_v9 = vld [vmem:[%s1912_s1 + $0x48] sm:$0xff] (!%p227_p9)  ;;  %v276_v10 = vld [vmem:[%s1912_s1 + $0x18] sm:$0xff] (!%p227_p9)  ;;  %v712_v14 = vld [vmem:[%s1913_s2] sm:$0xff] (!%p227_p9)  ;;  %p261_p10 = scmp.lt.s32.totalorder (!%p227_p9), %s1183_s20, 3  ;;  %v1630_v44 = vshrl.u32 (!%p227_p9), %v370_v40, 7  ;;  %vm1848_vm4 = vcmp.lt.s32.totalorder (!%p227_p9), %v370_v40, 256 }
  0x10   : > { %v1510_v11 = vld [vmem:[%s1912_s1 + $0x58] sm:$0xff] (!%p227_p9)  ;;  %v1516_v12 = vld [vmem:[%s1912_s1 + $0x68] sm:$0xff] (!%p227_p9)  ;;  %v279_v16 = vld [vmem:[%s1912_s1 + $0x30] sm:$0xff] (!%p227_p9)  ;;  %s1193_s13 = sshll.u32 (!%p227_p9), %s1447_s25, 6  ;;  %s1390_s19 = smov (!%p227_p9), [#allocation2]  }
  0x11   : > { %v1523_v13 = vld [vmem:[%s1912_s1 + $0x78] sm:$0xff] (!%p227_p9)  ;;  %v713_v15 = vld [vmem:[%s1913_s2 + $0x8] sm:$0xff] (!%p227_p9)  ;;  %v714_v17 = vld [vmem:[%s1913_s2 + $0x10] sm:$0xff] (!%p227_p9)  ;;  %v1644_v48 = vsub.s32 (!%p227_p9), 1, %v1630_v44  ;;  %v490_v49 = vsub.s32 (!%p227_p9), 5, %v1630_v44  ;;  %v1650_v52 = vsub.s32 (!%p227_p9), 0, %v1630_v44  ;;  %s1864_s17 = scalar_lea.hbm (!%p227_p9), %s1917_s6, %s1193_s13 }
  0x12   : > { %v716_v18 = vld [vmem:[%s1913_s2 + $0x20] sm:$0xff] (!%p227_p9)  ;;  %v715_v19 = vld [vmem:[%s1913_s2 + $0x18] sm:$0xff] (!%p227_p9)  ;;  %v718_v20 = vld [vmem:[%s1913_s2 + $0x30] sm:$0xff] (!%p227_p9)  ;;  %v376_v53 = vsub.s32 (!%p227_p9), 4, %v1630_v44  ;;  %v632_v55 = vsub.s32 (!%p227_p9), 2, %v1630_v44  ;;  %v636_v56 = vsub.s32 (!%p227_p9), 6, %v1630_v44 }
  0x13   : > { %575 = vperm.xlu0 (!%p227_p9), %1271, %v275_v3   ;;  %425 = vperm.xlu1 (!%p227_p9), %1270, %v274_v4   ;;  %v720_v21 = vld [vmem:[%s1913_s2 + $0x40] sm:$0xff] (!%p227_p9)  ;;  %v722_v22 = vld [vmem:[%s1913_s2 + $0x50] sm:$0xff] (!%p227_p9)  ;;  %v717_v23 = vld [vmem:[%s1913_s2 + $0x28] sm:$0xff] (!%p227_p9) }
  0x14   : > { %v281_v24 = vld [vmem:[%s1912_s1 + $0x40] sm:$0xff] (!%p227_p9)  ;;  %v727_v26 = vld [vmem:[%s1913_s2 + $0x78] sm:$0xff] (!%p227_p9)  ;;  %v283_v28 = vld [vmem:[%s1912_s1 + $0x50] sm:$0xff] (!%p227_p9) }
  0x15   : > { %v724_v25 = vld [vmem:[%s1913_s2 + $0x60] sm:$0xff]  ;;  %v719_v27 = vld [vmem:[%s1913_s2 + $0x38] sm:$0xff]  ;;  %v721_v29 = vld [vmem:[%s1913_s2 + $0x48] sm:$0xff]  ;;  %s1927_s20 = smov (!%p261_p10, %s1183_s20), 3 }
  0x16   : > { %v285_v32 = vld [vmem:[%s1912_s1 + $0x60] sm:$0xff]  ;;  %s1184_s26 = sshll.u32 %s1927_s20, 2  ;;  %v723_v43 = vld [vmem:[%s1913_s2 + $0x58] sm:$0xff]  ;;  %v287_v47 = vld [vmem:[%s1912_s1 + $0x70] sm:$0xff]  ;;  %s269_s10 = scalar_lea.vmem %s1916_s5, %s1927_s20 }
  0x17   : > { %587 = vperm.xlu0 %1271, %v278_v5   ;;  %1272 = vset.pattern.permute.xlu1 %v1385_v1  ;;  %s264_s11 = scalar_lea.vmem %s1911_s0, %s1184_s26  ;;  %s257_s20 = sand.u32 1, %s1375_s22  }
  0x18   : > { %571 = vperm.xlu1 %1272, %v274_v4   ;;  %v272_v50 = vld [vmem:[%s264_s11] sm:$0x77]  ;;  %s1182_s11 = sshll.u32 %s257_s20, 2  ;;  %s1096_s18 = scalar_lea.sflag [#allocation3], %s257_s20 }
  0x19   : > { %v487_v57 = vrot.slane %v272_v50, %v1644_v48  ;;  %v491_v58 = vrot.slane %v272_v50, %v490_v49  ;;  %v373_v59 = vrot.slane %v272_v50, %v1650_v52  ;;  %v377_v60 = vrot.slane %v272_v50, %v376_v53  ;;  %s1852_s12 = scalar_lea.vmem [#allocation2], %s1182_s11  ;;  %s1325_s26 = sshll.u32 %s1390_s19, 4  ;;  %s1326_s26 = int_to_ptr.vmem [resolvable:$false] %s1325_s26 }
  0x1a   : > { %v633_v63 = vrot.slane %v272_v50, %v632_v55  ;;  %s1110_s14 = sshll.u32 %s1852_s12, 4  ;;  %s1327_s28 = scalar_lea.vmem %s1326_s26, 128  ;;  %s1866_s14 = int_to_ptr.vmem [resolvable:$true] %s1110_s14 }
  0x1b   : > { %1279 = vset.pattern.permute.xlu0 %v1386_v2  ;;  %s1321_s25 = scalar_lea.vmem %s1866_s14, 64  ;;  %p1328_p0 = scmp.lt.s32.totalorder %s1866_s14, %s1326_s26 }
  0x1c   : > { %437 = vperm.xlu0 %1279, %v277_v6   ;;  %1273 = vset.pattern.permute.xlu1 %v1387_v7  ;;  %p1322_p11 = scmp.ne.s32.totalorder %s1866_s14, %s1321_s25  ;;  %p1329_p1 = scmp.lt.s32.totalorder %s1327_s28, %s1321_s25 }
  0x1d   : > { %301 = vperm.xlu1 %1273, %v275_v3  }
  0x1e   : > { %p1323_p12 = pnand %p1322_p11, %p1464_p5  ;;  %p1330_p2 = por %p1329_p1, %p1328_p0 }
  0x20   : > { %449 = vperm.xlu0 %1279, %v280_v8   ;;  %p1324_p13 = pneg %p1323_p12 }
  0x21   : > { %1274 = vset.pattern.permute.xlu1 %v1386_v2 }
  0x22   : > { %429 = vperm.xlu1 %1274, %v275_v3   ;;  %v1663_v3 = vrot.slane %v487_v57, %v1644_v48  ;;  %p1331_p3 = pnand %p1330_p2, %p1324_p13 }
  0x24   : > { %457 = vperm.xlu0 %1279, %v1501_v9  }
  0x26   : > { %433 = vperm.xlu1 %1274, %v276_v10  }
  0x28   : > { %465 = vperm.xlu0 %1279, %v1510_v11  }
  0x2a   : > { %1275 = vset.pattern.permute.xlu1 %v1385_v1 }
  0x2b   : > { %579 = vperm.xlu1 %1275, %v276_v10  }
  0x2c   : > { %473 = vperm.xlu0 %1279, %v1516_v12  }
  0x2f   : > { %1276 = vset.pattern.permute.xlu1 %v1387_v7 }
  0x30   : > { %481 = vperm.xlu0 %1279, %v1523_v13   ;;  %730 = vperm.xlu1 %1276, %v712_v14  }
  0x34   : > { %1294 = vset.pattern.permute.xlu0 %v1387_v7  ;;  %311 = vperm.xlu1 %1276, %v277_v6  }
  0x35   : > { %291 = vperm.xlu0 %1294, %v273_v0   ;;  %v637_v0 = vrot.slane %v272_v50, %v636_v56  ;;  %v726_v50 = vld [vmem:[%s1913_s2 + $0x70] sm:$0xff] }
  0x38   : > { %316 = vperm.xlu1 %1276, %v278_v5  }
  0x39   : > { %296 = vperm.xlu0 %1294, %v274_v4   ;;  %v1666_v4 = vrot.slane %v491_v58, %v1644_v48 }
  0x3c   : > { %1277 = vset.pattern.permute.xlu1 %v1386_v2 }
  0x3d   : > { %306 = vperm.xlu0 %1294, %v276_v10   ;;  %441 = vperm.xlu1 %1277, %v278_v5   ;;  %v1669_v5 = vrot.slane %v373_v59, %v1650_v52 }
  0x41   : > { %735 = vperm.xlu0 %1294, %v713_v15   ;;  %1278 = vset.pattern.permute.xlu1 %v1385_v1 }
  0x42   : > { %583 = vperm.xlu1 %1278, %v277_v6   ;;  %v1672_v6 = vrot.slane %v377_v60, %v1650_v52 }
  0x45   : > { %321 = vperm.xlu0 %1294, %v279_v16  }
  0x46   : > { %1280 = vset.pattern.permute.xlu1 %v1387_v7 }
  0x47   : > { %740 = vperm.xlu1 %1280, %v714_v17  }
  0x49   : > { %750 = vperm.xlu0 %1294, %v716_v18  }
  0x4b   : > { %745 = vperm.xlu1 %1280, %v715_v19  }
  0x4d   : > { %336 = vperm.xlu0 %1294, %v1501_v9  }
  0x4f   : > { %326 = vperm.xlu1 %1280, %v280_v8  }
  0x51   : > { %760 = vperm.xlu0 %1294, %v718_v20  }
  0x53   : > { %1281 = vset.pattern.permute.xlu1 %v1386_v2 }
  0x54   : > { %445 = vperm.xlu1 %1281, %v279_v16  }
  0x55   : > { %346 = vperm.xlu0 %1294, %v1510_v11  }
  0x58   : > { %1282 = vset.pattern.permute.xlu1 %v1385_v1 }
  0x59   : > { %591 = vperm.xlu1 %1282, %v279_v16   ;;  %770 = vperm.xlu0 %1294, %v720_v21  }
  0x5d   : > { %595 = vperm.xlu1 %1282, %v280_v8   ;;  %356 = vperm.xlu0 %1294, %v1516_v12  }
  0x61   : > { %1283 = vset.pattern.permute.xlu1 %v1387_v7  ;;  %780 = vperm.xlu0 %1294, %v722_v22  }
  0x62   : > { %755 = vperm.xlu1 %1283, %v717_v23  }
  0x65   : > { %366 = vperm.xlu0 %1294, %v1523_v13  }
  0x66   : > { %331 = vperm.xlu1 %1283, %v281_v24  }
  0x69   : > { %790 = vperm.xlu0 %1294, %v724_v25  }
  0x6a   : > { %1284 = vset.pattern.permute.xlu1 %v1386_v2 }
  0x6b   : > { %453 = vperm.xlu1 %1284, %v281_v24  }
  0x6d   : > { %805 = vperm.xlu0 %1294, %v727_v26  }
  0x6f   : > { %1285 = vset.pattern.permute.xlu1 %v1385_v1 }
  0x70   : > { %599 = vperm.xlu1 %1285, %v281_v24  }
  0x74   : > { %603 = vperm.xlu1 %1285, %v1501_v9   ;;  %v1678_v9 = vrot.slane %v637_v0, %v632_v55 }
  0x78   : > { %1286 = vset.pattern.permute.xlu1 %v1387_v7 }
  0x79   : > { %765 = vperm.xlu1 %1286, %v719_v27  }
  0x7d   : > { %341 = vperm.xlu1 %1286, %v283_v28  }
  0x81   : > { %1287 = vset.pattern.permute.xlu1 %v1386_v2 }
  0x82   : > { %461 = vperm.xlu1 %1287, %v283_v28  }
  0x86   : > { %1288 = vset.pattern.permute.xlu1 %v1385_v1 }
  0x87   : > { %607 = vperm.xlu1 %1288, %v283_v28   ;;  %v725_v28 = vld [vmem:[%s1913_s2 + $0x68] sm:$0xff] }
  0x8b   : > { %611 = vperm.xlu1 %1288, %v1510_v11  }
  0x8e   : > { %v1593_v30 = vpop.permute.xlu1 %421  ;;  %v1595_v31 = vpop.permute.xlu0 %567 }
  0x8f   : > { %1289 = vset.pattern.permute.xlu1 %v1387_v7  ;;  %v502_v11 = vmul.f32 %v1663_v3, %v1593_v30  ;;  %v649_v17 = vmul.f32 %v1678_v9, %v1595_v31 }
  0x90   : > { %775 = vperm.xlu1 %1289, %v721_v29  }
  0x92   : > { %v1601_v33 = vpop.permute.xlu1 %425  ;;  %v1603_v34 = vpop.permute.xlu0 %575 }
  0x93   : > { %v504_v21 = vmul.f32 %v1663_v3, %v1601_v33  ;;  %v505_v22 = vmul.f32 %v1666_v4, %v1601_v33 }
  0x94   : > { %351 = vperm.xlu1 %1289, %v285_v32  }
  0x96   : > { %v1605_v35 = vpop.permute.xlu0 %587 }
  0x97   : > { %v1607_v36 = vpop.permute.xlu1 %571 }
  0x98   : > { %1290 = vset.pattern.permute.xlu1 %v1386_v2  ;;  %v651_v33 = vmul.f32 %v1678_v9, %v1607_v36 }
  0x99   : > { %469 = vperm.xlu1 %1290, %v285_v32  }
  0x9b   : > { %v1611_v37 = vpop.permute.xlu0 %437 }
  0x9c   : > { %v1613_v38 = vpop.permute.xlu1 %301 }
  0x9d   : > { %1291 = vset.pattern.permute.xlu1 %v1385_v1  ;;  %v392_v56 = vmul.f32 %v1669_v5, %v1613_v38 }
  0x9e   : > { %615 = vperm.xlu1 %1291, %v285_v32  }
  0x9f   : > { %v1616_v39 = vpop.permute.xlu0 %449 }
  0xa1   : > { %v1620_v41 = vpop.permute.xlu1 %429 }
  0xa2   : > { %619 = vperm.xlu1 %1291, %v1516_v12   ;;  %v503_v12 = vmul.f32 %v1666_v4, %v1593_v30 }
  0xa3   : > { %v1623_v42 = vpop.permute.xlu0 %457 }
  0xa5   : > { %v1632_v45 = vpop.permute.xlu1 %433 }
  0xa6   : > { %1292 = vset.pattern.permute.xlu1 %v1387_v7 }
  0xa7   : > { %785 = vperm.xlu1 %1292, %v723_v43   ;;  %v1638_v46 = vpop.permute.xlu0 %465  ;;  %v507_v43 = vmul.f32 %v1666_v4, %v1620_v41 }
  0xaa   : > { %v1647_v51 = vpop.permute.xlu1 %579 }
  0xab   : > { %361 = vperm.xlu1 %1292, %v287_v47   ;;  %v1653_v54 = vpop.permute.xlu0 %473 }
  0xaf   : > { %1293 = vset.pattern.permute.xlu1 %v1386_v2  ;;  %v731_v61 = vpop.permute.xlu1 %730  ;;  %v1660_v62 = vpop.permute.xlu0 %481  ;;  %v1676_v2 = vrot.slane %v633_v63, %v632_v55 }
  0xb0   : > { %477 = vperm.xlu1 %1293, %v287_v47  }
  0xb1   : > { %v648_v16 = vmul.f32 %v1676_v2, %v1595_v31  ;;  %v650_v32 = vmul.f32 %v1676_v2, %v1607_v36  ;;  %v652_v36 = vmul.f32 %v1676_v2, %v1603_v34 }
  0xb3   : > { %v1674_v8 = vpop.permute.xlu1 %311 }
  0xb4   : > { %v292_v10 = vpop.permute.xlu0 %291  ;;  %1295 = vset.pattern.permute.xlu1 %v1385_v1 }
  0xb5   : > { %v388_v14 = vmul.f32 %v1669_v5, %v292_v10  ;;  %v389_v15 = vmul.f32 %v1672_v6, %v292_v10  ;;  %623 = vperm.xlu1 %1295, %v287_v47  }
  0xb7   : > { %v534_v18 = vadd.f32 %v502_v11, %v388_v14  ;;  %v535_v19 = vadd.f32 %v503_v12, %v389_v15  ;;  %v1691_v1 = vpop.permute.xlu1 %316  ;;  %v508_v11 = vmul.f32 %v1663_v3, %v1632_v45 }
  0xb8   : > { %v297_v20 = vpop.permute.xlu0 %296 }
  0xb9   : > { %v390_v23 = vmul.f32 %v1669_v5, %v297_v20  ;;  %v391_v24 = vmul.f32 %v1672_v6, %v297_v20  ;;  %627 = vperm.xlu1 %1295, %v1523_v13   ;;  %v680_v25 = vadd.f32 %v648_v16, %v534_v18  ;;  %v681_v29 = vadd.f32 %v649_v17, %v535_v19 }
  0xba   : > { %v506_v13 = vmul.f32 %v1663_v3, %v1620_v41  ;;  %v393_v41 = vmul.f32 %v1672_v6, %v1613_v38  ;;  %v873_v38 = vld [vmem:[%s1915_s4] sm:$0x3] }
  0xbb   : > { %v536_v26 = vadd.f32 %v504_v21, %v390_v23  ;;  %v537_v27 = vadd.f32 %v505_v22, %v391_v24  ;;  %v809_v53 = vadd.f32 %v731_v61, %v681_v29  ;;  %v808_v55 = vadd.f32 %v731_v61, %v680_v25 }
  0xbc   : > { %v307_v30 = vpop.permute.xlu0 %306  ;;  %v1703_v31 = vpop.permute.xlu1 %441  ;;  %v538_v0 = vadd.f32 %v506_v13, %v392_v56  ;;  %v539_v10 = vadd.f32 %v507_v43, %v393_v41  ;;  %v654_v22 = vmul.f32 %v1676_v2, %v1647_v51  ;;  %v396_v41 = vmul.f32 %v1669_v5, %v1674_v8 }
  0xbd   : > { %1296 = vset.pattern.permute.xlu1 %v1387_v7  ;;  %v682_v47 = vadd.f32 %v650_v32, %v536_v26  ;;  %v683_v49 = vadd.f32 %v651_v33, %v537_v27  ;;  %v653_v7 = vmul.f32 %v1678_v9, %v1603_v34  ;;  %v394_v58 = vmul.f32 %v1669_v5, %v307_v30 }
  0xbe   : > { %795 = vperm.xlu1 %1296, %v725_v28   ;;  %v395_v59 = vmul.f32 %v1672_v6, %v307_v30  ;;  %v509_v34 = vmul.f32 %v1666_v4, %v1632_v45  ;;  %v841_v14 = vmax.f32 %v809_v53, 0.0  ;;  %v840_v16 = vmax.f32 %v808_v55, 0.0 }
  0xbf   : > { %v540_v17 = vadd.f32 %v508_v11, %v394_v58  ;;  %v655_v45 = vmul.f32 %v1678_v9, %v1647_v51  ;;  %v684_v23 = vadd.f32 %v652_v36, %v538_v0  ;;  %v685_v24 = vadd.f32 %v653_v7, %v539_v10 }
  0xc0   : > { %v736_v57 = vpop.permute.xlu0 %735  ;;  %v541_v18 = vadd.f32 %v509_v34, %v395_v59  ;;  %v1388_v33 = vmov 0.0   ;;  %v510_v36 = vmul.f32 %v1663_v3, %v1611_v37  ;;  %v511_v7 = vmul.f32 %v1666_v4, %v1611_v37 }
  0xc1   : > { %v810_v60 = vadd.f32 %v736_v57, %v682_v47  ;;  %v811_v63 = vadd.f32 %v736_v57, %v683_v49  ;;  %v584_v61 = vpop.permute.xlu1 %583  ;;  %v686_v27 = vadd.f32 %v654_v22, %v540_v17  ;;  %943 = vmatprep.mubr.f32.mxu0 %v1388_v33  ;;  %v397_v57 = vmul.f32 %v1672_v6, %v1674_v8 }
  0xc2   : > { %800 = vperm.xlu1 %1296, %v726_v50   ;;  %v687_v28 = vadd.f32 %v655_v45, %v541_v18  ;;  %v512_v58 = vmul.f32 %v1663_v3, %v1703_v31  ;;  %v513_v59 = vmul.f32 %v1666_v4, %v1703_v31  ;;  %v399_v37 = vmul.f32 %v1672_v6, %v1691_v1 }
  0xc3   : > { %v842_v12 = vmax.f32 %v810_v60, 0.0  ;;  %v843_v15 = vmax.f32 %v811_v63, 0.0  ;;  %v398_v63 = vmul.f32 %v1669_v5, %v1691_v1  ;;  %v656_v0 = vmul.f32 %v1676_v2, %v584_v61 }
  0xc4   : > { %v322_v56 = vpop.permute.xlu0 %321  ;;  %v657_v10 = vmul.f32 %v1678_v9, %v584_v61  ;;  %v658_v8 = vmul.f32 %v1676_v2, %v1605_v35  ;;  %v659_v11 = vmul.f32 %v1678_v9, %v1605_v35  ;;  %v542_v34 = vadd.f32 %v510_v36, %v396_v41 }
  0xc5   : > { %v1194_v19 = vpack.c.bf16 %v843_v15, %v841_v14  ;;  %v1196_v20 = vpack.c.bf16 %v842_v12, %v840_v16  ;;  %v543_v12 = vadd.f32 %v511_v7, %v397_v57  ;;  %v544_v31 = vadd.f32 %v512_v58, %v398_v63 }
  0xc6   : > { %876 = vperm.xlu1 %1296, %v873_v38   ;;  %v741_v21 = vpop.permute.xlu1 %740  ;;  %v545_v38 = vadd.f32 %v513_v59, %v399_v37  ;;  %v688_v16 = vadd.f32 %v656_v0, %v542_v34 }
  0xc7   : > { %1195 = vmatprep.subr.bf16.mxu0 %v1194_v19  ;;  %v812_v25 = vadd.f32 %v741_v21, %v684_v23  ;;  %v813_v26 = vadd.f32 %v741_v21, %v685_v24  ;;  %v689_v17 = vadd.f32 %v657_v10, %v543_v12  ;;  %v690_v19 = vadd.f32 %v658_v8, %v544_v31 }
  0xc8   : > { %1197 = vmatpush1.bf16.msra.mxu0 %v1196_v20  ;;  %v751_v15 = vpop.permute.xlu0 %750  ;;  %v691_v20 = vadd.f32 %v659_v11, %v545_v38 }
  0xc9   : > { %v844_v13 = vmax.f32 %v812_v25, 0.0  ;;  %v845_v43 = vmax.f32 %v813_v26, 0.0  ;;  %v816_v18 = vadd.f32 %v751_v15, %v688_v16  ;;  %v817_v1 = vadd.f32 %v751_v15, %v689_v17 }
  0xca   : > { %v746_v29 = vpop.permute.xlu1 %745 }
  0xcb   : > { %v814_v30 = vadd.f32 %v746_v29, %v686_v27  ;;  %v815_v32 = vadd.f32 %v746_v29, %v687_v28  ;;  %v848_v45 = vmax.f32 %v816_v18, 0.0  ;;  %v849_v23 = vmax.f32 %v817_v1, 0.0 }
  0xcc   : > { %v400_v29 = vmul.f32 %v1669_v5, %v322_v56 }
  0xcd   : > { %v846_v47 = vmax.f32 %v814_v30, 0.0  ;;  %v847_v49 = vmax.f32 %v815_v32, 0.0  ;;  %v401_v30 = vmul.f32 %v1672_v6, %v322_v56 }
  0xce   : > { %v327_v50 = vpop.permute.xlu1 %326 }
  0xcf   : > { %v1198_v53 = vpack.c.bf16 %v847_v49, %v845_v43  ;;  %v1200_v51 = vpack.c.bf16 %v846_v47, %v844_v13  ;;  %v337_v13 = vpop.permute.xlu0 %336  ;;  %v402_v36 = vmul.f32 %v1669_v5, %v327_v50  ;;  %v403_v7 = vmul.f32 %v1672_v6, %v327_v50 }
  0xd1   : > { %1199 = vmatprep.subr.bf16.mxu0 %v1198_v53  ;;  %v516_v53 = vmul.f32 %v1663_v3, %v1616_v39 }
  0xd2   : > { %1201 = vmatpush1.bf16.msra.mxu0 %v1200_v51  ;;  %v517_v51 = vmul.f32 %v1666_v4, %v1616_v39 }
  0xd3   : > { %v446_v55 = vpop.permute.xlu1 %445  ;;  %v761_v63 = vpop.permute.xlu0 %760  ;;  %v548_v37 = vadd.f32 %v516_v53, %v402_v36 }
  0xd4   : > { %v514_v32 = vmul.f32 %v1663_v3, %v446_v55  ;;  %v515_v33 = vmul.f32 %v1666_v4, %v446_v55  ;;  %v549_v0 = vadd.f32 %v517_v51, %v403_v7 }
  0xd6   : > { %v546_v56 = vadd.f32 %v514_v32, %v400_v29  ;;  %v547_v41 = vadd.f32 %v515_v33, %v401_v30 }
  0xd8   : > { %v592_v60 = vpop.permute.xlu1 %591 }
  0xd9   : > { %v660_v43 = vmul.f32 %v1676_v2, %v592_v60  ;;  %v661_v47 = vmul.f32 %v1678_v9, %v592_v60 }
  0xdb   : > { %v692_v57 = vadd.f32 %v660_v43, %v546_v56  ;;  %v693_v55 = vadd.f32 %v661_v47, %v547_v41 }
  0xdc   : > { %v596_v14 = vpop.permute.xlu1 %595 }
  0xdd   : > { %v662_v58 = vmul.f32 %v1676_v2, %v596_v14  ;;  %v663_v59 = vmul.f32 %v1678_v9, %v596_v14  ;;  %v820_v10 = vadd.f32 %v761_v63, %v692_v57  ;;  %v821_v8 = vadd.f32 %v761_v63, %v693_v55 }
  0xdf   : > { %v694_v11 = vadd.f32 %v662_v58, %v548_v37  ;;  %v695_v39 = vadd.f32 %v663_v59, %v549_v0  ;;  %v852_v50 = vmax.f32 %v820_v10, 0.0  ;;  %v853_v38 = vmax.f32 %v821_v8, 0.0 }
  0xe1   : > { %v756_v21 = vpop.permute.xlu1 %755 }
  0xe2   : > { %v818_v61 = vadd.f32 %v756_v21, %v690_v19  ;;  %v819_v22 = vadd.f32 %v756_v21, %v691_v20  ;;  %v520_v21 = vmul.f32 %v1663_v3, %v1623_v42 }
  0xe4   : > { %v850_v24 = vmax.f32 %v818_v61, 0.0  ;;  %v851_v25 = vmax.f32 %v819_v22, 0.0  ;;  %v521_v61 = vmul.f32 %v1666_v4, %v1623_v42  ;;  %v406_v22 = vmul.f32 %v1669_v5, %v337_v13 }
  0xe5   : > { %v332_v35 = vpop.permute.xlu1 %331 }
  0xe6   : > { %v1202_v26 = vpack.c.bf16 %v851_v25, %v849_v23  ;;  %v1204_v27 = vpack.c.bf16 %v850_v24, %v848_v45  ;;  %v407_v45 = vmul.f32 %v1672_v6, %v337_v13  ;;  %v404_v23 = vmul.f32 %v1669_v5, %v332_v35 }
  0xe7   : > { %v405_v24 = vmul.f32 %v1672_v6, %v332_v35  ;;  %v552_v32 = vadd.f32 %v520_v21, %v406_v22 }
  0xe8   : > { %1203 = vmatprep.subr.bf16.mxu0 %v1202_v26  ;;  %v553_v33 = vadd.f32 %v521_v61, %v407_v45 }
  0xe9   : > { %1205 = vmatpush1.bf16.msra.mxu0 %v1204_v27 }
  0xea   : > { %v454_v28 = vpop.permute.xlu1 %453 }
  0xeb   : > { %v518_v19 = vmul.f32 %v1663_v3, %v454_v28  ;;  %v519_v20 = vmul.f32 %v1666_v4, %v454_v28  ;;  %v347_v28 = vpop.permute.xlu0 %346 }
  0xed   : > { %v550_v29 = vadd.f32 %v518_v19, %v404_v23  ;;  %v551_v30 = vadd.f32 %v519_v20, %v405_v24 }
  0xef   : > { %v600_v49 = vpop.permute.xlu1 %599  ;;  %v771_v51 = vpop.permute.xlu0 %770 }
  0xf0   : > { %v664_v25 = vmul.f32 %v1676_v2, %v600_v49  ;;  %v665_v26 = vmul.f32 %v1678_v9, %v600_v49 }
  0xf2   : > { %v696_v43 = vadd.f32 %v664_v25, %v550_v29  ;;  %v697_v42 = vadd.f32 %v665_v26, %v551_v30 }
  0xf3   : > { %v604_v60 = vpop.permute.xlu1 %603 }
  0xf4   : > { %v666_v47 = vmul.f32 %v1676_v2, %v604_v60  ;;  %v667_v13 = vmul.f32 %v1678_v9, %v604_v60  ;;  %v824_v36 = vadd.f32 %v771_v51, %v696_v43  ;;  %v825_v35 = vadd.f32 %v771_v51, %v697_v42 }
  0xf6   : > { %v698_v7 = vadd.f32 %v666_v47, %v552_v32  ;;  %v699_v56 = vadd.f32 %v667_v13, %v553_v33  ;;  %v857_v59 = vmax.f32 %v825_v35, 0.0  ;;  %v856_v63 = vmax.f32 %v824_v36, 0.0 }
  0xf8   : > { %v766_v34 = vpop.permute.xlu1 %765 }
  0xf9   : > { %v822_v12 = vadd.f32 %v766_v34, %v694_v11  ;;  %v823_v31 = vadd.f32 %v766_v34, %v695_v39 }
  0xfb   : > { %v854_v15 = vmax.f32 %v822_v12, 0.0  ;;  %v855_v16 = vmax.f32 %v823_v31, 0.0 }
  0xfc   : > { %v342_v17 = vpop.permute.xlu1 %341 }
  0xfd   : > { %v1206_v18 = vpack.c.bf16 %v855_v16, %v853_v38  ;;  %v1208_v1 = vpack.c.bf16 %v854_v15, %v852_v50  ;;  %v408_v39 = vmul.f32 %v1669_v5, %v342_v17  ;;  %v409_v34 = vmul.f32 %v1672_v6, %v342_v17  ;;  %v357_v16 = vpop.permute.xlu0 %356 }
  0xfe   : > { %v524_v38 = vmul.f32 %v1663_v3, %v1638_v46  ;;  %v525_v15 = vmul.f32 %v1666_v4, %v1638_v46 }
  0xff   : > { %1207 = vmatprep.subr.bf16.mxu0 %v1206_v18  ;;  %v410_v18 = vmul.f32 %v1669_v5, %v347_v28 }
 0x100   : > { %1209 = vmatpush1.bf16.msra.mxu0 %v1208_v1  ;;  %v411_v1 = vmul.f32 %v1672_v6, %v347_v28 }
 0x101   : > { %v462_v14 = vpop.permute.xlu1 %461  ;;  %v556_v45 = vadd.f32 %v524_v38, %v410_v18  ;;  %v781_v24 = vpop.permute.xlu0 %780 }
 0x102   : > { %v522_v60 = vmul.f32 %v1663_v3, %v462_v14  ;;  %v523_v11 = vmul.f32 %v1666_v4, %v462_v14  ;;  %v557_v23 = vadd.f32 %v525_v15, %v411_v1 }
 0x104   : > { %v554_v14 = vadd.f32 %v522_v60, %v408_v39  ;;  %v555_v19 = vadd.f32 %v523_v11, %v409_v34  ;;  %v533_v60 = vmul.f32 %v1666_v4, %v1660_v62 }
 0x106   : > { %v608_v27 = vpop.permute.xlu1 %607 }
 0x107   : > { %v668_v12 = vmul.f32 %v1676_v2, %v608_v27  ;;  %v669_v31 = vmul.f32 %v1678_v9, %v608_v27 }
 0x109   : > { %v700_v20 = vadd.f32 %v668_v12, %v554_v14  ;;  %v701_v17 = vadd.f32 %v669_v31, %v555_v19 }
 0x10a   : > { %v612_v53 = vpop.permute.xlu1 %611 }
 0x10b   : > { %v670_v21 = vmul.f32 %v1676_v2, %v612_v53  ;;  %v671_v61 = vmul.f32 %v1678_v9, %v612_v53  ;;  %v828_v25 = vadd.f32 %v781_v24, %v700_v20  ;;  %v829_v26 = vadd.f32 %v781_v24, %v701_v17 }
 0x10d   : > { %v702_v46 = vadd.f32 %v670_v21, %v556_v45  ;;  %v703_v27 = vadd.f32 %v671_v61, %v557_v23  ;;  %v861_v43 = vmax.f32 %v829_v26, 0.0  ;;  %v860_v42 = vmax.f32 %v828_v25, 0.0 }
 0x10f   : > { %v776_v41 = vpop.permute.xlu1 %775 }
 0x110   : > { %v826_v49 = vadd.f32 %v776_v41, %v698_v7  ;;  %v827_v57 = vadd.f32 %v776_v41, %v699_v56 }
 0x112   : > { %v858_v55 = vmax.f32 %v826_v49, 0.0  ;;  %v859_v58 = vmax.f32 %v827_v57, 0.0  ;;  %v528_v57 = vmul.f32 %v1663_v3, %v1653_v54 }
 0x113   : > { %v352_v37 = vpop.permute.xlu1 %351 }
 0x114   : > { %v1210_v0 = vpack.c.bf16 %v859_v58, %v857_v59  ;;  %v1212_v10 = vpack.c.bf16 %v858_v55, %v856_v63  ;;  %v412_v7 = vmul.f32 %v1669_v5, %v352_v37  ;;  %v413_v56 = vmul.f32 %v1672_v6, %v352_v37  ;;  %v367_v58 = vpop.permute.xlu0 %366 }
 0x115   : > { %v529_v55 = vmul.f32 %v1666_v4, %v1653_v54  ;;  %v414_v59 = vmul.f32 %v1669_v5, %v357_v16  ;;  %v415_v63 = vmul.f32 %v1672_v6, %v357_v16  ;;  %v532_v37 = vmul.f32 %v1663_v3, %v1660_v62 }
 0x116   : > { %1211 = vmatprep.subr.bf16.mxu0 %v1210_v0  ;;  %v418_v11 = vmul.f32 %v1669_v5, %v367_v58  ;;  %v419_v39 = vmul.f32 %v1672_v6, %v367_v58 }
 0x117   : > { %1213 = vmatpush1.bf16.msra.mxu0 %v1212_v10  ;;  %v560_v12 = vadd.f32 %v528_v57, %v414_v59  ;;  %v561_v31 = vadd.f32 %v529_v55, %v415_v63  ;;  %v872_v55 = vld [vmem:[%s1914_s3] sm:$0x3] }
 0x118   : > { %v470_v8 = vpop.permute.xlu1 %469  ;;  %v791_v16 = vpop.permute.xlu0 %790  ;;  %v564_v19 = vadd.f32 %v532_v37, %v418_v11  ;;  %v565_v20 = vadd.f32 %v533_v60, %v419_v39 }
 0x119   : > { %v526_v36 = vmul.f32 %v1663_v3, %v470_v8  ;;  %v527_v35 = vmul.f32 %v1666_v4, %v470_v8 }
 0x11b   : > { %v558_v0 = vadd.f32 %v526_v36, %v412_v7  ;;  %v559_v10 = vadd.f32 %v527_v35, %v413_v56 }
 0x11d   : > { %v616_v50 = vpop.permute.xlu1 %615 }
 0x11e   : > { %v672_v41 = vmul.f32 %v1676_v2, %v616_v50  ;;  %v673_v49 = vmul.f32 %v1678_v9, %v616_v50 }
 0x120   : > { %v704_v34 = vadd.f32 %v672_v41, %v558_v0  ;;  %v705_v54 = vadd.f32 %v673_v49, %v559_v10 }
 0x121   : > { %v620_v22 = vpop.permute.xlu1 %619 }
 0x122   : > { %v674_v50 = vmul.f32 %v1676_v2, %v620_v22  ;;  %v675_v38 = vmul.f32 %v1678_v9, %v620_v22  ;;  %v832_v17 = vadd.f32 %v791_v16, %v704_v34  ;;  %v833_v21 = vadd.f32 %v791_v16, %v705_v54 }
 0x124   : > { %v706_v25 = vadd.f32 %v674_v50, %v560_v12 }
 0x126   : > { %v786_v29 = vpop.permute.xlu1 %785 }
 0x127   : > { %v830_v30 = vadd.f32 %v786_v29, %v702_v46  ;;  %v831_v32 = vadd.f32 %v786_v29, %v703_v27 }
 0x129   : > { %v862_v28 = vmax.f32 %v830_v30, 0.0  ;;  %v863_v33 = vmax.f32 %v831_v32, 0.0  ;;  %v806_v32 = vpop.permute.xlu0 %805 }
 0x12a   : > { %v362_v47 = vpop.permute.xlu1 %361 }
 0x12b   : > { %v1214_v13 = vpack.c.bf16 %v863_v33, %v861_v43  ;;  %v1216_v51 = vpack.c.bf16 %v862_v28, %v860_v42  ;;  %v416_v61 = vmul.f32 %v1669_v5, %v362_v47  ;;  %v417_v45 = vmul.f32 %v1672_v6, %v362_v47 }
 0x12c   : > { %v865_v43 = vmax.f32 %v833_v21, 0.0  ;;  %v864_v5 = vmax.f32 %v832_v17, 0.0 }
 0x12d   : > { %1215 = vmatprep.subr.bf16.mxu0 %v1214_v13 }
 0x12e   : > { %1217 = vmatpush1.bf16.msra.mxu0 %v1216_v51 }
 0x12f   : > { %v478_v53 = vpop.permute.xlu1 %477 }
 0x130   : > { %v530_v18 = vmul.f32 %v1663_v3, %v478_v53  ;;  %v531_v1 = vmul.f32 %v1666_v4, %v478_v53  ;;  %v707_v4 = vadd.f32 %v675_v38, %v561_v31 }
 0x132   : > { %v562_v26 = vadd.f32 %v530_v18, %v416_v61  ;;  %v563_v46 = vadd.f32 %v531_v1, %v417_v45 }
 0x134   : > { %v624_v8 = vpop.permute.xlu1 %623 }
 0x135   : > { %v676_v22 = vmul.f32 %v1676_v2, %v624_v8  ;;  %v677_v23 = vmul.f32 %v1678_v9, %v624_v8 }
 0x137   : > { %v708_v28 = vadd.f32 %v676_v22, %v562_v26  ;;  %v709_v33 = vadd.f32 %v677_v23, %v563_v46 }
 0x138   : > { %v628_v15 = vpop.permute.xlu1 %627 }
 0x139   : > { %v678_v62 = vmul.f32 %v1676_v2, %v628_v15  ;;  %v679_v14 = vmul.f32 %v1678_v9, %v628_v15 }
 0x13b   : > { %v710_v24 = vadd.f32 %v678_v62, %v564_v19  ;;  %v711_v3 = vadd.f32 %v679_v14, %v565_v20  ;;  %v1837_v19 = vld [vmem:[%s269_s10] sm:$0x3] }
 0x13c   : > { %v995_v26 = vrot.slane %v1837_v19, %v1644_v48 }
 0x13d   : > { %v796_v27 = vpop.permute.xlu1 %795  ;;  %v838_v42 = vadd.f32 %v806_v32, %v710_v24  ;;  %v839_v6 = vadd.f32 %v806_v32, %v711_v3  ;;  %v991_v24 = vrot.slane %v1837_v19, %v1650_v52 }
 0x13e   : > { %v834_v29 = vadd.f32 %v796_v27, %v706_v25  ;;  %v835_v30 = vadd.f32 %v796_v27, %v707_v4 }
 0x13f   : > { %v871_v56 = vmax.f32 %v839_v6, 0.0  ;;  %v870_v41 = vmax.f32 %v838_v42, 0.0 }
 0x140   : > { %v866_v47 = vmax.f32 %v834_v29, 0.0  ;;  %v867_v2 = vmax.f32 %v835_v30, 0.0 }
 0x141   : > { %v801_v13 = vpop.permute.xlu1 %800 }
 0x142   : > { %v836_v9 = vadd.f32 %v801_v13, %v708_v28  ;;  %v837_v51 = vadd.f32 %v801_v13, %v709_v33  ;;  %v1218_v53 = vpack.c.bf16 %v867_v2, %v865_v43  ;;  %v1220_v36 = vpack.c.bf16 %v866_v47, %v864_v5 }
 0x143   : > { %v1389_v47 = vmov 1966171168  }
 0x144   : > { %v868_v35 = vmax.f32 %v836_v9, 0.0  ;;  %v869_v7 = vmax.f32 %v837_v51, 0.0  ;;  %1219 = vmatprep.subr.bf16.mxu0 %v1218_v53  ;;  %v1018_v2 = vunpack.c.l.s4 %v1389_v47 }
 0x145   : > { %1221 = vmatpush1.bf16.msra.mxu0 %v1220_v36  ;;  %v877_v58 = vpop.permute.xlu1 %876 }
 0x146   : > { %v1222_v49 = vpack.c.bf16 %v871_v56, %v869_v7  ;;  %v1224_v57 = vpack.c.bf16 %v870_v41, %v868_v35  ;;  %v1019_v51 = vunpack.c.0.s8 %v1018_v2 }
 0x148   : > { %1223 = vmatprep.subr.bf16.mxu0 %v1222_v49  ;;  %v1022_v7 = vsub.s32 %v1019_v51, %v1630_v44 }
 0x149   : > { %1225 = vmatpush1.bf16.msra.mxu0 %v1224_v57 }
 0x14c   : > { %944 = vmatmul.mubr.f32.vlgmr.msra.gmra.mrb[0].mxu0 %v872_v55 }
 0x21f   : > { %v945_v59 = vpop.f32.mrb[0].mxu0 }
 0x220   : > { %v946_v63 = vadd.f32 %v945_v59, %v877_v58  ;;  %v947_v0 = vpop.f32.mrb[1].mxu0 }
 0x221   : > { %v948_v10 = vadd.f32 %v947_v0, %v877_v58 }
 0x222   : > { %v956_v8 = vand.u32 2147483647, %v946_v63  ;;  %v950_v61 = vmax.f32 %v946_v63, 0.0  ;;  %vm952_vm2 = vcmp.ne.f32.partialorder %v946_v63, %v946_v63 }
 0x223   : > { %v957_v37 = vand.u32 2147483647, %v948_v10  ;;  %v951_v3 = vmax.f32 %v948_v10, 0.0  ;;  %vm953_vm3 = vcmp.ne.f32.partialorder %v948_v10, %v948_v10 }
 0x224   : > { %v958_v60 = vsub.f32 0.0, %v956_v8 }
 0x225   : > { %v959_v11 = vsub.f32 0.0, %v957_v37  ;;  %v1008_v37 = vmul.f32 -0.5, %v1837_v19 }
 0x226   : > { %v960_v39 = vmul.f32 1.442695, %v958_v60 }
 0x227   : > { %v962_v34 = vmul.f32 1.442695, %v959_v11 }
 0x228   : > { %1297 = vpow2.f32 %v960_v39  ;;  %v1009_v39 = vmul.f32 %v1008_v37, %v1837_v19 }
 0x229   : > { %1299 = vpow2.f32 %v962_v34 }
 0x232   : > { %v1298_v54 = vpop.eup %1297 }
 0x233   : > { %v1300_v12 = vpop.eup %1299  ;;  %v964_v31 = vadd.f32 1.0, %v1298_v54  ;;  %v967_v38 = vmul.f32 -0.5, %v1298_v54  ;;  %v970_v18 = vand.u32 2147483647, %v1298_v54 }
 0x234   : > { %v973_v50 = vadd.f32 1.0, %v1300_v12  ;;  %v976_v15 = vmul.f32 -0.5, %v1300_v12  ;;  %v979_v62 = vand.u32 2147483647, %v1300_v12 }
 0x235   : > { %1301 = vlog2.f32 %v964_v31  ;;  %v968_v16 = vadd.f32 1.0, %v967_v38  ;;  %vm971_vm0 = vcmp.lt.f32.partialorder %v970_v18, 0.0004427343 }
 0x236   : > { %1303 = vlog2.f32 %v973_v50  ;;  %v977_v1 = vadd.f32 1.0, %v976_v15  ;;  %vm980_vm1 = vcmp.lt.f32.partialorder %v979_v62, 0.0004427343 }
 0x237   : > { %v969_v21 = vmul.f32 %v1298_v54, %v968_v16 }
 0x238   : > { %v978_v22 = vmul.f32 %v1300_v12, %v977_v1 }
 0x23f   : > { %v1302_v14 = vpop.eup %1301 }
 0x240   : > { %v1304_v20 = vpop.eup %1303  ;;  %v966_v17 = vmul.f32 0.6931472, %v1302_v14 }
 0x241   : > { %v975_v45 = vmul.f32 0.6931472, %v1304_v20 }
 0x242   : > { %v972_v23 = vsel %vm971_vm0, %v969_v21, %v966_v17 }
 0x243   : > { %v982_v25 = vadd.f32 %v972_v23, %v950_v61  ;;  %v981_v4 = vsel %vm980_vm1, %v978_v22, %v975_v45 }
 0x244   : > { %v983_v46 = vadd.f32 %v981_v4, %v951_v3 }
 0x245   : > { %v984_v27 = vsel %vm952_vm2, %v946_v63, %v982_v25 }
 0x246   : > { %v998_v29 = vmul.f32 %v991_v24, %v984_v27  ;;  %1305 = vlog2.f32 %v984_v27  ;;  %v985_v30 = vsel %vm953_vm3, %v948_v10, %v983_v46 }
 0x247   : > { %v999_v32 = vmul.f32 %v995_v26, %v985_v30  ;;  %1307 = vlog2.f32 %v985_v30 }
 0x248   : > { %v1002_v28 = vrot.slane %v998_v29, 1 }
 0x249   : > { %v1003_v33 = vrot.slane %v999_v32, 1 }
 0x24a   : > { %v1006_v52 = vadd.f32 %v1002_v28, %v946_v63 }
 0x24b   : > { %v1007_v43 = vadd.f32 %v1003_v33, %v948_v10 }
 0x24c   : > { %1309 = vtanh.f32 %v1006_v52 }
 0x24d   : > { %1311 = vtanh.f32 %v1007_v43 }
 0x250   : > { %v1306_v5 = vpop.eup %1305 }
 0x251   : > { %v1308_v42 = vpop.eup %1307  ;;  %v1011_v48 = vmul.f32 0.6931472, %v1306_v5 }
 0x252   : > { %v1013_v6 = vmul.f32 0.6931472, %v1308_v42 }
 0x254   : > { %v1016_v13 = vcombine.low %v1011_v48, %v1013_v6 }
 0x256   : > { %v1310_v9 = vpop.eup %1309  ;;  %v1023_v40 = vrot.slane %v1016_v13, %v1022_v7 }
 0x257   : > { %v1312_v53 = vpop.eup %1311  ;;  %1313 = vtanh.f32 %v1310_v9  ;;  %v1068_v36 = vmul.f32 2.0, %v1310_v9 }
 0x258   : > { %1315 = vtanh.f32 %v1312_v53  ;;  %v1069_v35 = vmul.f32 2.0, %v1312_v53  ;;  %v1024_v60 = vcombine.high %v1023_v40, %v1023_v40 }
 0x25a   : > { %v1072_v56 = vcombine.low %v1068_v36, %v1069_v35  ;;  %v1031_v34 = vrot.slane %v1024_v60, %v1022_v7 }
 0x25c   : > { %v1079_v41 = vrot.slane %v1072_v56, %v1022_v7  ;;  %v1033_v50 = vsub.f32 %v1009_v39, %v1031_v34 }
 0x25e   : > { %v1086_v57 = vrot.slane %v1079_v41, %v1022_v7  ;;  %v1186_v16 = vadd.f32 -0.9189385, %v1033_v50 }
 0x260   : > { %1092 = vst.msk [vmem:[%s1852_s12] ss:$2 sm:$0x3] %vm1848_vm4, %v1086_v57 }
 0x261   : > { %v1314_v55 = vpop.eup %1313 }
 0x262   : > { %v1316_v58 = vpop.eup %1315  ;;  %v1039_v59 = vmul.f32 %v1314_v55, %v1314_v55 }
 0x263   : > { %v1040_v63 = vmul.f32 %v1316_v58, %v1316_v58 }
 0x264   : > { %v1041_v0 = vsub.f32 1.0, %v1039_v59 }
 0x265   : > { %v1042_v44 = vsub.f32 1.0, %v1040_v63 }
 0x266   : > { %v1043_v10 = vadd.f32 1e-07, %v1041_v0 }
 0x267   : > { %v1044_v8 = vadd.f32 1e-07, %v1042_v44 }
 0x268   : > { %1317 = vlog2.f32 %v1043_v10 }
 0x269   : > { %1319 = vlog2.f32 %v1044_v8 }
 0x272   : > { %v1318_v11 = vpop.eup %1317 }
 0x273   : > { %v1320_v54 = vpop.eup %1319  ;;  %v1046_v12 = vmul.f32 0.6931472, %v1318_v11 }
 0x274   : > { %v1048_v31 = vmul.f32 0.6931472, %v1320_v54 }
 0x276   : > { %v1051_v38 = vcombine.low %v1046_v12, %v1048_v31 }
 0x278   : > { %v1058_v15 = vrot.slane %v1051_v38, %v1022_v7 }
 0x27a   : > { %v1065_v18 = vrot.slane %v1058_v15, %v1022_v7 }
 0x27c   : > { %v1067_v1 = vsub.f32 %v1186_v16, %v1065_v18 }
 0x27e   : > { %1187 = vst.msk [vmem:[%s1852_s12 + $0x1] ss:$2 sm:$0x3] %vm1848_vm4, %v1067_v1 }
 0x27f   : > { %1334 = shalt.err (!%p1331_p3)
}
 0x280   : > { %s1335_s29 = scalar_lea.hbm %s1864_s17, 64  ;;  %s1339_s20 = scalar_lea.hbm %s1917_s6, 128 }
 0x281   : > { %p1336_p4 = scmp.ne.s32.totalorder %s1864_s17, %s1335_s29  ;;  %p1340_p9 = scmp.lt.u32.totalorder %s1864_s17, %s1917_s6 }
 0x282   : > { %p1341_p10 = scmp.lt.u32.totalorder %s1339_s20, %s1335_s29  ;;  %p1343_p12 = scmp.lt.u32.totalorder %s1335_s29, %s1864_s17 }
 0x283   : > { %p1337_p7 = pnand %p1336_p4, %p1464_p5 }
 0x284   : > { %p1342_p11 = por %p1341_p10, %p1340_p9 }
 0x285   : > { %p1338_p8 = pneg %p1337_p7 }
 0x286   : > { %p1344_p13 = por %p1343_p12, %p1342_p11 }
 0x288   : > { %p1345_p0 = pnand %p1344_p13, %p1338_p8 }
 0x28a   : > { %1348 = shalt.err (!%p1345_p0)
}
 0x28b   : > { %1226 = dma.vmem_to_hbm [thread:$0]  (%p1464_p5), %s1866_s14, 64, %s1864_s17, %s1096_s18  }
 0x28c PF: > { %p1232_p1 = scmp.ge.s32.totalorder %s1383_s24, 2  ;;  %s1122_s13 = sand.u32 1, %s1371_s21  }
 0x28d   : > { %s1123_s15 = scalar_lea.sflag [#allocation3], %s1122_s13 }
 0x28e   : > { %p1229_p2 = pnand %p1232_p1, %p1468_p6 }
 0x290   : > { %1366 = dma.done.wait (!%p1229_p2), %s1123_s15, 64  }
 0x291   : > { %1368 = vsyncadd (!%p1229_p2), %s1123_s15, 4294967232  ;;  %p16_p3 = scmp.ge.s32.totalorder %s1451_s27, 4   ;;  %s1922_s21 = smov %s1375_s22 }
 0x292   : > { %s1923_s22 = smov %s1379_s23  ;;  %s1924_s23 = smov %s1462_s30 }
 0x293   : > { %s1925_s24 = smov %s1451_s27  ;;  %18 = sbr.rel (!%p16_p3) target bundleno = 3 (0x3), region = 83 }
 0x29a   :  { %1128 = vsyncpa [#allocation3], 1 }
 0x29b   :  { %1130 = vsyncpa [#allocation3 + $0x1], 1 }

</bundles_post_ra>
